<compile_context>
chip_gen: v6e
topology: v6e:2x2x1
jax: 0.10.0
libtpu: 0.0.40
codegen_flags: <defaults>
</compile_context>

<pallas_src>
import functools

import jax
import jax.numpy as jnp
from jax import lax
from jax.experimental import pallas as pl
from jax.experimental.pallas import tpu as pltpu

EPS = 1e-8            # F.cosine_similarity default eps
_VPU_CIN_MAX = 16     # first layer on the VPU (broadcast-FMA) when C_in <= this


def _round_up(v, m):
    return -(-v // m) * m


def _vmem_capacity_bytes():
    """Physical VMEM per TensorCore (64 MiB on v7x, 128 MiB on v5e/v6e)."""
    try:
        cap = getattr(pltpu.get_tpu_info(), "vmem_capacity_bytes", None)
        if cap:
            return max(32 << 20, min(int(cap), 128 << 20))
    except Exception:
        pass
    return 64 << 20  # conservative default (v7x)


def _pick_tile_hw(HW, C_in, hidden, C_aug, x_itemsize, budget_bytes):
    """Largest lane tile (multiple of 128, <=4096) whose working set fits."""
    c_in_sub = _round_up(C_in, 8)
    per_col = (2 * c_in_sub * x_itemsize      # x block (double-buffered)
               + hidden * (4 + 2)             # h: f32 + bf16 copy
               + 2 * C_aug * 4                # paug f32 + pred/pn2/cos temporaries
               + 8 * 4)                       # running-max scratch + slack
    fixed = (2 * C_aug * max(hidden, 128) * 2    # w2aug block (bf16, double-buffered)
             + hidden * max(c_in_sub, 128) * 4   # resident w1 (lane-padded)
             + (64 << 10))                       # biases / output / misc
    tile = max(budget_bytes - fixed, 128 * per_col) // per_col
    tile = max(128, min(int(tile) // 128 * 128, 4096))
    return min(tile, _round_up(HW, 128))


def _fold_target(target, w2, b2):
    """Fold target & its norm clamp into extra layer-2 weights/bias rows."""
    tgt = target.astype(jnp.float32)
    w2t = jnp.transpose(w2).astype(jnp.float32)          # (C_out, hidden)
    b2f = b2.astype(jnp.float32)
    inv_t = 1.0 / jnp.maximum(
        jnp.sqrt(jnp.sum(tgt * tgt, axis=-1, keepdims=True)), EPS)   # (N, 1)
    tn = tgt * inv_t                                      # t / max(||t||, eps)
    tw2 = jnp.einsum("nc,ch->nh", tn, w2t, precision=lax.Precision.HIGHEST)
    tb2 = jnp.sum(tn * b2f[None, :], axis=-1)             # (N,)
    return tw2, tb2, w2t, b2f


def dense_match_kernel(x_ref, w1_ref, b1_ref, w2aug_ref, b2aug_ref,
                       out_ref, run_ref, *, c_in, c_out, vpu_l1):
    """grid = (N [parallel], HW/tile_hw [arbitrary]).

    x_ref     : (1, C_in, tile_hw)   f32/bf16  dense features, HW on lanes
    w1_ref    : (hidden, C_in)       f32 (VPU path) / bf16 (MXU path), resident
    b1_ref    : (hidden, 1)          f32, resident
    w2aug_ref : (1, C_aug, hidden)   bf16   [W2^T ; t_n^ @ W2^T ; 0-pad], per-n
    b2aug_ref : (1, C_aug, 1)        f32    [b2   ; t_n^ . b2   ; 0-pad], per-n
    out_ref   : (1, 1, 128)          f32    per-sample max cos (lane-broadcast)
    run_ref   : (1, tile_hw)         f32    lane-resident running spatial max
    """
    hw = pl.program_id(1)

    @pl.when(hw == 0)
    def _():
        run_ref[...] = jnp.full(run_ref.shape, -jnp.inf, dtype=run_ref.dtype)

    b1 = b1_ref[...]                                        # (hidden, 1) f32

    if vpu_l1:
        # Tiny C_in: broadcast-FMA on the VPU keeps the MXU free for layer 2
        # and avoids padding the MXU K dimension (128/256) with zeros.
        x = x_ref[0].astype(jnp.float32)                    # (C_in, tile_hw)
        w1 = w1_ref[...]                                    # (hidden, C_in) f32
        acc = w1[:, 0:1] * x[0:1, :]
        for c in range(1, c_in):
            acc = acc + w1[:, c:c + 1] * x[c:c + 1, :]
        h = acc + b1                                        # (hidden, tile_hw) f32
    else:
        x = x_ref[0].astype(jnp.bfloat16)                   # cast tile in-kernel
        h = jnp.dot(w1_ref[...], x, preferred_element_type=jnp.float32) + b1

    h = jnp.maximum(h, 0.0).astype(jnp.bfloat16)            # ReLU, bf16 for MXU

    # Single MXU pass produces both pred (rows [0, c_out)) and the cosine
    # numerator (row c_out, already scaled by 1/max(||t||, eps)).
    w2aug = w2aug_ref[0]                                    # (C_aug, hidden) bf16
    b2aug = b2aug_ref[0]                                    # (C_aug, 1) f32
    paug = jnp.dot(w2aug, h, preferred_element_type=jnp.float32) + b2aug

    pred = paug[:c_out, :]                                  # (C_out, tile_hw)
    num = paug[c_out:c_out + 1, :]                          # (1, tile_hw)
    pn2 = jnp.sum(pred * pred, axis=0, keepdims=True)       # (1, tile_hw)
    # rsqrt(max(pn2, eps^2)) == 1 / max(||pred||, eps)  (per-norm clamp, EUP slot)
    cos = num * lax.rsqrt(jnp.maximum(pn2, jnp.float32(EPS * EPS)))

    run_ref[...] = jnp.maximum(run_ref[...], cos)           # VPU only, lane-resident

    @pl.when(hw == pl.num_programs(1) - 1)
    def _():
        m = jnp.max(run_ref[...])                           # one cross-lane reduce
        out_ref[...] = jnp.broadcast_to(m, out_ref.shape)   # lane-dense 128-wide store


def dense_match_head(x_nchw, target, w1, b1, w2, b2, *, tile_hw=None):
    """x_nchw: (N, C_in, H, W); target: (N, C_out). Returns dict(loss=scalar)."""
    N, C_in, H, W = x_nchw.shape
    HW = H * W
    hidden = w1.shape[1]
    C_out = w2.shape[1]
    C_aug = _round_up(C_out + 1, 8)
    vpu_l1 = C_in <= _VPU_CIN_MAX

    # NCHW -> (N, C_in, H*W): a pure reshape. Keep the producer dtype — no
    # standalone bf16 cast pass over the dominant HBM stream (the MXU path
    # casts tiles in-kernel; a real pipeline would have the producer emit bf16).
    x = x_nchw.reshape(N, C_in, HW)
    if not jnp.issubdtype(x.dtype, jnp.floating):
        x = x.astype(jnp.float32)

    # Layer-1 weights, resident.
    w1t = jnp.transpose(w1).astype(jnp.float32 if vpu_l1 else jnp.bfloat16)
    b1c = b1.reshape(hidden, 1).astype(jnp.float32)

    # Fold the target (and its norm clamp) into per-sample augmented layer-2
    # weights/bias; rows [C_out+1, C_aug) are zero padding to a sublane multiple.
    tgt = target.reshape(N, C_out)
    tw2, tb2, w2t, b2f = _fold_target(tgt, w2, b2)
    w2aug = jnp.zeros((N, C_aug, hidden), jnp.float32)
    w2aug = w2aug.at[:, :C_out, :].set(w2t[None])
    w2aug = w2aug.at[:, C_out, :].set(tw2)
    w2aug = w2aug.astype(jnp.bfloat16)
    b2aug = jnp.zeros((N, C_aug, 1), jnp.float32)
    b2aug = b2aug.at[:, :C_out, 0].set(b2f[None, :])
    b2aug = b2aug.at[:, C_out, 0].set(tb2)

    # Generation-aware spatial tiling and VMEM limit (v7x: 64 MiB/TC, v5e/v6e: 128 MiB).
    cap = _vmem_capacity_bytes()
    if tile_hw is None:
        tile_hw = _pick_tile_hw(HW, C_in, hidden, C_aug,
                                jnp.dtype(x.dtype).itemsize, int(cap * 0.5))
    HW_pad = _round_up(HW, tile_hw)
    if HW_pad != HW:
        # Edge-replication keeps the spatial max unchanged (no masking needed).
        x = jnp.pad(x, ((0, 0), (0, 0), (0, HW_pad - HW)), mode="edge")

    grid = (N, HW_pad // tile_hw)
    kernel = functools.partial(dense_match_kernel,
                               c_in=C_in, c_out=C_out, vpu_l1=vpu_l1)

    # Note: if the x DMA ever shows up exposed (small hidden/C_out, mem-bound),
    # pipeline_mode=pl.Buffered(3) on the x BlockSpec is the next knob to try.
    max_sim = pl.pallas_call(
        kernel,
        out_shape=jax.ShapeDtypeStruct((N, 1, 128), jnp.float32),
        grid_spec=pltpu.PrefetchScalarGridSpec(
            num_scalar_prefetch=0,
            grid=grid,
            in_specs=[
                pl.BlockSpec((1, C_in, tile_hw), lambda n, h: (n, 0, h)),   # x
                pl.BlockSpec((hidden, C_in), lambda n, h: (0, 0)),          # W1^T (resident)
                pl.BlockSpec((hidden, 1), lambda n, h: (0, 0)),             # b1   (resident)
                pl.BlockSpec((1, C_aug, hidden), lambda n, h: (n, 0, 0)),   # [W2^T; t^W2^T] per-n
                pl.BlockSpec((1, C_aug, 1), lambda n, h: (n, 0, 0)),        # [b2; t^.b2]   per-n
            ],
            out_specs=pl.BlockSpec((1, 1, 128), lambda n, h: (n, 0, 0)),
            scratch_shapes=[pltpu.VMEM((1, tile_hw), jnp.float32)],         # running max
        ),
        compiler_params=pltpu.CompilerParams(
            # sample axis parallel (v7x megacore, grid[0] = N >= 2 samples),
            # HW axis is the sequential running-max reduction.
            dimension_semantics=("parallel", "arbitrary"),
            vmem_limit_bytes=int(cap * 0.85),
        ),
    )(x, w1t, b1c, w2aug, b2aug)

    max_sim = max_sim[:, 0, 0]                 # (N,)
    loss = -2.0 * jnp.sum(max_sim)
    loss = loss / N + 2.0                      # size_average=True path
    return {"loss": loss}


def reference(x_nchw, target, w1, b1, w2, b2, *, mirror_kernel_precision):
    """Pure-JAX reference mirroring the PyTorch forward.

    mirror_kernel_precision=True mirrors the kernel's mixed precision
    (f32/bf16) for a tight check; False is the full-f32 PyTorch-equivalent math.
    """
    N, C_in, H, W = x_nchw.shape
    HW = H * W
    hp = lax.Precision.HIGHEST
    x = x_nchw.reshape(N, C_in, HW).astype(jnp.float32)
    w1t = jnp.transpose(w1).astype(jnp.float32)
    b1f = b1.astype(jnp.float32)
    tgt = target.reshape(N, -1).astype(jnp.float32)

    if not mirror_kernel_precision:
        w2t = jnp.transpose(w2).astype(jnp.float32)
        b2f = b2.astype(jnp.float32)
        h = jnp.maximum(jnp.einsum("hc,nci->nhi", w1t, x, precision=hp)
                        + b1f[None, :, None], 0.0)
        pred = jnp.einsum("oh,nhi->noi", w2t, h, precision=hp) + b2f[None, :, None]
        t3 = tgt[:, :, None]
        num = jnp.sum(pred * t3, axis=1)
        denom = (jnp.maximum(jnp.sqrt(jnp.sum(pred * pred, axis=1)), EPS)
                 * jnp.maximum(jnp.sqrt(jnp.sum(t3 * t3, axis=1)), EPS))
        cos = num / denom
    else:
        q = lambda a: a.astype(jnp.bfloat16).astype(jnp.float32)
        if C_in > _VPU_CIN_MAX:
            x, w1t = q(x), q(w1t)
        h = jnp.maximum(jnp.einsum("hc,nci->nhi", w1t, x, precision=hp)
                        + b1f[None, :, None], 0.0)
        h = q(h)
        tw2, tb2, w2t, b2f = _fold_target(tgt, w2, b2)
        pred = jnp.einsum("oh,nhi->noi", q(w2t), h, precision=hp) + b2f[None, :, None]
        num = jnp.einsum("nh,nhi->ni", q(tw2), h, precision=hp) + tb2[:, None]
        inv_p = lax.rsqrt(jnp.maximum(jnp.sum(pred * pred, axis=1),
                                      jnp.float32(EPS * EPS)))
        cos = num * inv_p

    max_sim = jnp.max(cos, axis=-1)
    loss = -2.0 * jnp.sum(max_sim)
    return loss / N + 2.0


if __name__ == "__main__":
    key = jax.random.PRNGKey(0)
    kx, kt, kw1, kb1, kw2, kb2 = jax.random.split(key, 6)

    N, C_in, H, W = 2, 4, 16, 16
    hidden, C_out = 32, 32

    x = jax.random.normal(kx, (N, C_in, H, W), jnp.float32)
    target = jax.random.normal(kt, (N, C_out), jnp.float32)
    w1 = jax.random.normal(kw1, (C_in, hidden), jnp.float32) * 0.1
    b1 = jax.random.normal(kb1, (hidden,), jnp.float32) * 0.1
    w2 = jax.random.normal(kw2, (hidden, C_out), jnp.float32) * 0.1
    b2 = jax.random.normal(kb2, (C_out,), jnp.float32) * 0.1

    # tile_hw=128 -> two HW tiles per sample, exercising the running-max path.
    out = dense_match_head(x, target, w1, b1, w2, b2, tile_hw=128)
    loss = jax.block_until_ready(out["loss"])

    ref_q = reference(x, target, w1, b1, w2, b2, mirror_kernel_precision=True)
    ref_f32 = reference(x, target, w1, b1, w2, b2, mirror_kernel_precision=False)
    assert jnp.allclose(loss, ref_q, atol=5e-3, rtol=5e-3), (loss, ref_q)
    assert jnp.allclose(loss, ref_f32, atol=5e-2, rtol=5e-2), (loss, ref_f32)
    print("KERNEL_OK")
</pallas_src>

<mosaic_0001>
module attributes {stable_mosaic.version = 11 : i64} {
  func.func @dense_match_kernel(%arg0: i32, %arg1: i32, %arg2: memref<1x4x128xf32, #tpu.memory_space<vmem>>, %arg3: memref<32x4xf32, #tpu.memory_space<vmem>>, %arg4: memref<32x1xf32, #tpu.memory_space<vmem>>, %arg5: memref<1x40x32xbf16, #tpu.memory_space<vmem>>, %arg6: memref<1x40x1xf32, #tpu.memory_space<vmem>>, %arg7: memref<1x1x128xf32, #tpu.memory_space<vmem>>, %arg8: memref<1x128xf32, #tpu.memory_space<vmem>>) attributes {dimension_semantics = [#tpu.dimension_semantics<parallel>, #tpu.dimension_semantics<arbitrary>], iteration_bounds = array<i64: 2, 2>, scalar_prefetch = 0 : i64, scratch_operands = 1 : i64, tpu.core_type = #tpu.core_type<tc>, window_params = [{transform_indices = @transform_0, window_bounds = array<i64: 1, 4, 128>}, {pipeline_mode = #tpu.pipeline_mode<synchronous>, transform_indices = @transform_1, window_bounds = array<i64: 32, 4>}, {pipeline_mode = #tpu.pipeline_mode<synchronous>, transform_indices = @transform_2, window_bounds = array<i64: 32, 1>}, {transform_indices = @transform_3, window_bounds = array<i64: 1, 40, 32>}, {transform_indices = @transform_4, window_bounds = array<i64: 1, 40, 1>}, {transform_indices = @transform_5, window_bounds = array<i64: 1, 1, 128>}]} {
    %c0_i32 = arith.constant 0 : i32
    %0 = arith.cmpi eq, %arg1, %c0_i32 : i32
    %1 = arith.extui %0 : i1 to i32
    %c0_i32_0 = arith.constant 0 : i32
    %2 = arith.cmpi ne, %1, %c0_i32_0 : i32
    scf.if %2 {
      %cst_21 = arith.constant 0xFF800000 : f32
      %57 = vector.broadcast %cst_21 : f32 to vector<1x128xf32>
      %c0_22 = arith.constant 0 : index
      %c0_23 = arith.constant 0 : index
      %58 = vector.load %arg8[%c0_22, %c0_23] : memref<1x128xf32, #tpu.memory_space<vmem>>, vector<1x128xf32>
      tpu.vector_store %arg8[%c0_22, %c0_23], %57 {strides = array<i32>} : memref<1x128xf32, #tpu.memory_space<vmem>>, vector<1x128xf32>,
    } else {
    }
    %c0 = arith.constant 0 : index
    %c0_1 = arith.constant 0 : index
    %3 = vector.load %arg4[%c0, %c0_1] : memref<32x1xf32, #tpu.memory_space<vmem>>, vector<32x1xf32>
    %c0_2 = arith.constant 0 : index
    %c0_3 = arith.constant 0 : index
    %c0_4 = arith.constant 0 : index
    %4 = vector.load %arg2[%c0_2, %c0_3, %c0_4] : memref<1x4x128xf32, #tpu.memory_space<vmem>>, vector<1x4x128xf32>
    %5 = vector.shape_cast %4 : vector<1x4x128xf32> to vector<4x128xf32>
    %c0_5 = arith.constant 0 : index
    %c0_6 = arith.constant 0 : index
    %6 = vector.load %arg3[%c0_5, %c0_6] : memref<32x4xf32, #tpu.memory_space<vmem>>, vector<32x4xf32>
    %7 = vector.extract_strided_slice %6 {offsets = [0, 0], sizes = [32, 1], strides = [1, 1]} : vector<32x4xf32> to vector<32x1xf32>
    %8 = vector.extract_strided_slice %5 {offsets = [0, 0], sizes = [1, 128], strides = [1, 1]} : vector<4x128xf32> to vector<1x128xf32>
    %9 = vector.broadcast %7 : vector<32x1xf32> to vector<32x128xf32>
    %10 = vector.broadcast %8 : vector<1x128xf32> to vector<32x128xf32>
    %11 = arith.mulf %9, %10 : vector<32x128xf32>
    %12 = vector.extract_strided_slice %6 {offsets = [0, 1], sizes = [32, 1], strides = [1, 1]} : vector<32x4xf32> to vector<32x1xf32>
    %13 = vector.extract_strided_slice %5 {offsets = [1, 0], sizes = [1, 128], strides = [1, 1]} : vector<4x128xf32> to vector<1x128xf32>
    %14 = vector.broadcast %12 : vector<32x1xf32> to vector<32x128xf32>
    %15 = vector.broadcast %13 : vector<1x128xf32> to vector<32x128xf32>
    %16 = arith.mulf %14, %15 : vector<32x128xf32>
    %17 = arith.addf %11, %16 : vector<32x128xf32>
    %18 = vector.extract_strided_slice %6 {offsets = [0, 2], sizes = [32, 1], strides = [1, 1]} : vector<32x4xf32> to vector<32x1xf32>
    %19 = vector.extract_strided_slice %5 {offsets = [2, 0], sizes = [1, 128], strides = [1, 1]} : vector<4x128xf32> to vector<1x128xf32>
    %20 = vector.broadcast %18 : vector<32x1xf32> to vector<32x128xf32>
    %21 = vector.broadcast %19 : vector<1x128xf32> to vector<32x128xf32>
    %22 = arith.mulf %20, %21 : vector<32x128xf32>
    %23 = arith.addf %17, %22 : vector<32x128xf32>
    %24 = vector.extract_strided_slice %6 {offsets = [0, 3], sizes = [32, 1], strides = [1, 1]} : vector<32x4xf32> to vector<32x1xf32>
    %25 = vector.extract_strided_slice %5 {offsets = [3, 0], sizes = [1, 128], strides = [1, 1]} : vector<4x128xf32> to vector<1x128xf32>
    %26 = vector.broadcast %24 : vector<32x1xf32> to vector<32x128xf32>
    %27 = vector.broadcast %25 : vector<1x128xf32> to vector<32x128xf32>
    %28 = arith.mulf %26, %27 : vector<32x128xf32>
    %29 = arith.addf %23, %28 : vector<32x128xf32>
    %30 = vector.broadcast %3 : vector<32x1xf32> to vector<32x128xf32>
    %31 = arith.addf %29, %30 : vector<32x128xf32>
    %cst = arith.constant 0.000000e+00 : f32
    %32 = vector.broadcast %cst : f32 to vector<32x128xf32>
    %33 = arith.maximumf %31, %32 : vector<32x128xf32>
    %34 = arith.truncf %33 : vector<32x128xf32> to vector<32x128xbf16>
    %c0_7 = arith.constant 0 : index
    %c0_8 = arith.constant 0 : index
    %c0_9 = arith.constant 0 : index
    %35 = vector.load %arg5[%c0_7, %c0_8, %c0_9] : memref<1x40x32xbf16, #tpu.memory_space<vmem>>, vector<1x40x32xbf16>
    %36 = vector.shape_cast %35 : vector<1x40x32xbf16> to vector<40x32xbf16>
    %c0_10 = arith.constant 0 : index
    %c0_11 = arith.constant 0 : index
    %c0_12 = arith.constant 0 : index
    %37 = vector.load %arg6[%c0_10, %c0_11, %c0_12] : memref<1x40x1xf32, #tpu.memory_space<vmem>>, vector<1x40x1xf32>
    %38 = vector.shape_cast %37 : vector<1x40x1xf32> to vector<40x1xf32>
    %cst_13 = arith.constant dense<0.000000e+00> : vector<40x128xf32>
    %39 = tpu.matmul %36, %34, %cst_13 {dimension_numbers = #tpu.dot_dimension_numbers<[1], [0], [0], [1], [0, 0, 1, 1], [], []>} : vector<40x32xbf16>, vector<32x128xbf16>, vector<40x128xf32> -> vector<40x128xf32>
    %40 = vector.broadcast %38 : vector<40x1xf32> to vector<40x128xf32>
    %41 = arith.addf %39, %40 : vector<40x128xf32>
    %42 = vector.extract_strided_slice %41 {offsets = [0, 0], sizes = [32, 128], strides = [1, 1]} : vector<40x128xf32> to vector<32x128xf32>
    %43 = vector.extract_strided_slice %41 {offsets = [32, 0], sizes = [1, 128], strides = [1, 1]} : vector<40x128xf32> to vector<1x128xf32>
    %44 = arith.mulf %42, %42 : vector<32x128xf32>
    %cst_14 = arith.constant dense<0.000000e+00> : vector<128xf32>
    %45 = vector.multi_reduction <add>, %44, %cst_14 [0] : vector<32x128xf32> to vector<128xf32>
    %46 = vector.shape_cast %45 : vector<128xf32> to vector<1x128xf32>
    %cst_15 = arith.constant 1.000000e-16 : f32
    %47 = vector.broadcast %cst_15 : f32 to vector<1x128xf32>
    %48 = arith.maximumf %46, %47 : vector<1x128xf32>
    %49 = math.rsqrt %48 : vector<1x128xf32>
    %50 = arith.mulf %43, %49 : vector<1x128xf32>
    %c0_16 = arith.constant 0 : index
    %c0_17 = arith.constant 0 : index
    %51 = vector.load %arg8[%c0_16, %c0_17] : memref<1x128xf32, #tpu.memory_space<vmem>>, vector<1x128xf32>
    %52 = arith.maximumf %51, %50 : vector<1x128xf32>
    %c0_18 = arith.constant 0 : index
    %c0_19 = arith.constant 0 : index
    %53 = vector.load %arg8[%c0_18, %c0_19] : memref<1x128xf32, #tpu.memory_space<vmem>>, vector<1x128xf32>
    tpu.vector_store %arg8[%c0_18, %c0_19], %52 {strides = array<i32>} : memref<1x128xf32, #tpu.memory_space<vmem>>, vector<1x128xf32>,
    %c1_i32 = arith.constant 1 : i32
    %54 = arith.cmpi eq, %arg1, %c1_i32 : i32
    %55 = arith.extui %54 : i1 to i32
    %c0_i32_20 = arith.constant 0 : i32
    %56 = arith.cmpi ne, %55, %c0_i32_20 : i32
    scf.if %56 {
      %c0_21 = arith.constant 0 : index
      %c0_22 = arith.constant 0 : index
      %57 = vector.load %arg8[%c0_21, %c0_22] : memref<1x128xf32, #tpu.memory_space<vmem>>, vector<1x128xf32>
      %58 = vector.shape_cast %57 : vector<1x128xf32> to vector<1x1x128xf32>
      %cst_23 = arith.constant dense<0xFF800000> : vector<1xf32>
      %59 = vector.multi_reduction <maximumf>, %58, %cst_23 [1, 2] : vector<1x1x128xf32> to vector<1xf32>
      %60 = vector.shape_cast %59 : vector<1xf32> to vector<1x1x1xf32>
      %61 = vector.extract %60[0, 0, 0] : f32 from vector<1x1x1xf32>
      %62 = vector.broadcast %61 : f32 to vector<1x1x128xf32>
      %c0_24 = arith.constant 0 : index
      %c0_25 = arith.constant 0 : index
      %c0_26 = arith.constant 0 : index
      %63 = vector.load %arg7[%c0_24, %c0_25, %c0_26] : memref<1x1x128xf32, #tpu.memory_space<vmem>>, vector<1x1x128xf32>
      tpu.vector_store %arg7[%c0_24, %c0_25, %c0_26], %62 {strides = array<i32>} : memref<1x1x128xf32, #tpu.memory_space<vmem>>, vector<1x1x128xf32>,
    } else {
    }
    return
  }
  func.func @transform_0(%arg0: i32, %arg1: i32) -> (i32, i32, i32) {
    %c0_i32 = arith.constant 0 : i32
    %c0_i32_0 = arith.constant 0 : i32
    return %arg0, %c0_i32, %arg1 : i32, i32, i32
  }
  func.func @transform_1(%arg0: i32, %arg1: i32) -> (i32, i32) {
    %c0_i32 = arith.constant 0 : i32
    %c0_i32_0 = arith.constant 0 : i32
    %c0_i32_1 = arith.constant 0 : i32
    return %c0_i32, %c0_i32_0 : i32, i32
  }
  func.func @transform_2(%arg0: i32, %arg1: i32) -> (i32, i32) {
    %c0_i32 = arith.constant 0 : i32
    %c0_i32_0 = arith.constant 0 : i32
    %c0_i32_1 = arith.constant 0 : i32
    return %c0_i32, %c0_i32_0 : i32, i32
  }
  func.func @transform_3(%arg0: i32, %arg1: i32) -> (i32, i32, i32) {
    %c0_i32 = arith.constant 0 : i32
    %c0_i32_0 = arith.constant 0 : i32
    %c0_i32_1 = arith.constant 0 : i32
    return %arg0, %c0_i32, %c0_i32_0 : i32, i32, i32
  }
  func.func @transform_4(%arg0: i32, %arg1: i32) -> (i32, i32, i32) {
    %c0_i32 = arith.constant 0 : i32
    %c0_i32_0 = arith.constant 0 : i32
    %c0_i32_1 = arith.constant 0 : i32
    return %arg0, %c0_i32, %c0_i32_0 : i32, i32, i32
  }
  func.func @transform_5(%arg0: i32, %arg1: i32) -> (i32, i32, i32) {
    %c0_i32 = arith.constant 0 : i32
    %c0_i32_0 = arith.constant 0 : i32
    %c0_i32_1 = arith.constant 0 : i32
    return %arg0, %c0_i32, %c0_i32_0 : i32, i32, i32
  }
}

</mosaic_0001>

<bundles_post_ra>
// kernel: tpu_custom_call.1
= control target key start
LH: loop header
LB: loop body
LE: loop exit
PB: predicated region body
PF: predicated region fallthrough
CT: control target
= control target key end

     0   :  { %10 = vsyncpa [#allocation4], 0  ;;  %s1163_s0 = inlined_call_operand.vmem [shape: f32[2,4,256], index: 0, kind: input, shape index: {}]   ;;  %s1164_s1 = inlined_call_operand.vmem [shape: f32[32,4], index: 1, kind: input, shape index: {}]   ;;  %s1165_s2 = inlined_call_operand.vmem [shape: f32[32,1], index: 2, kind: input, shape index: {}]   ;;  %s1166_s3 = inlined_call_operand.vmem [shape: bf16[2,40,32], index: 3, kind: input, shape index: {}]   ;;  %s1167_s4 = inlined_call_operand.vmem [shape: f32[2,40,1], index: 4, kind: input, shape index: {}]   ;;  %s1168_s5 = inlined_call_operand.hbm [shape: f32[2,1,128], index: 5, kind: output, shape index: {}]  }
   0x1   :  { %12 = vsyncpa [#allocation4 + $0x1], 0  ;;  %s977_s18 = smov 0   ;;  %s979_s19 = smov 0  }
   0x2   :  { %s981_s20 = smov 0   ;;  %s983_s21 = smov 0  }
   0x3   :  { %s985_s22 = smov 0   ;;  %s987_s23 = smov 0  }
   0x4   :  { %s989_s24 = smov 0   ;;  %s991_s25 = smov 0  }
   0x5 LB: > { %1173 = sst [smem:[#allocation6_spill]] %s917_s20  ;;  %s702_s26 = sadd.s32 4294967295, %s937_s25   ;;  %s937_s25 = sphi %s991_s25, %s18_s25   ;;  %s933_s24 = sphi %s989_s24, %s1188_s24   ;;  %s929_s23 = sphi %s987_s23, %s1191_s23   ;;  %s925_s22 = sphi %s985_s22, %s1186_s22   ;;  %s921_s21 = sphi %s983_s21, %s1185_s21   ;;  %s917_s20 = sphi %s981_s20, %s1184_s20   ;;  %s913_s19 = sphi %s979_s19, %s1190_s19   ;;  %s909_s18 = sphi %s977_s18, %s1189_s18  }
   0x6   : > { %1174 = sst [smem:[#allocation7_spill]] %s929_s23  ;;  %s703_s27 = sadd.s32 4294967294, %s937_s25  }
   0x7   : > { %1175 = sst [smem:[#allocation8_spill]] %s933_s24  ;;  %s27_s28 = sadd.s32 1, %s929_s23 }
   0x8   : > { %p28_p0 = scmp.ge.s32.totalorder %s27_s28, 2  ;;  %s30_s29 = sadd.s32 1, %s933_s24 }
   0x9   : > { %p169_p1 = scmp.ne.s32.totalorder %s917_s20, %s913_s19  ;;  %p170_p2 = scmp.eq.s32.totalorder %s702_s26, 3 }
   0xa   : > { %s1193_s28 = smov (%p28_p0, %s27_s28), 0  ;;  %s1195_s29 = smov (!%p28_p0, %s30_s29), %s933_s24 }
   0xb   : > { %1176 = sst [smem:[#allocation9_spill]] %s1193_s28  ;;  %p1026_p3 = por %p170_p2, %p169_p1 }
   0xc   : > { %p175_p4 = scmp.ne.s32.totalorder %s913_s19, %s909_s18  ;;  %p32_p5 = scmp.ge.s32.totalorder %s1195_s29, 2 }
   0xd   : > { %p176_p6 = scmp.eq.s32.totalorder %s703_s27, 3  ;;  %p706_p7 = scmp.ge.s32.totalorder %s937_s25, 1 }
   0xe   : > { %p227_p8 = scmp.lt.s32.totalorder %s937_s25, 5  ;;  %s1197_s29 = smov (%p32_p5, %s1195_s29), 0 }
   0xf   : > { %1178 = sst [smem:[#allocation10_spill]] %s1197_s29  ;;  %p1036_p9 = por %p176_p6, %p175_p4 }
  0x10   : > { %p228_p10 = pnand %p706_p7, %p227_p8  ;;  %s156_s7 = ssub.s32 %s933_s24, %s1197_s29 }
  0x11   : > { %s159_s8 = sadd.s32 1, %s917_s20  ;;  %p157_p11 = scmp.eq.s32.totalorder %s156_s7, 0 }
  0x12   : > { %231 = sbr.rel (%p228_p10) target bundleno = 696 (0x2b8), region = 40  ;;  %p267_p12 = scmp.lt.s32.totalorder (!%p228_p10), %s925_s22, 1 }
  0x13   : > { %s1044_s9 = scalar_select %p157_p11, %s917_s20, %s159_s8  }
  0x14   : > { %p269_p13 = scmp.lt.s32.totalorder (!%p228_p10), %s921_s21, 1  ;;  %p711_p0 = scmp.ne.s32.totalorder (!%p228_p10), %s921_s21, 0 }
  0x15   : > { %1180 = sst [smem:[#allocation11_spill]] %s1044_s9  ;;  %s1181_s9 = sand.u32 (!%p228_p10), 1, %s913_s19  }
  0x16   : > { %s1068_s20 = scalar_lea.vmem (!%p228_p10), [#allocation3], %s1181_s9 }
  0x17   : > { %s268_s11 = scalar_select %p267_p12, %s925_s22, 1 }
  0x18   : > { %s270_s12 = scalar_select %p269_p13, %s921_s21, 1 }
  0x19   : > { %s707_s13 = sshll.u32 %s268_s11, 1  ;;  %s747_s14 = smul.u32 20, %s268_s11 }
  0x1a   : > { %s272_s15 = sadd.s32 %s707_s13, %s270_s12  ;;  %s748_s16 = smul.u32 40, %s268_s11 }
  0x1b   : > { %s708_s17 = sshll.u32 %s272_s15, 2  ;;  %s1054_s7 = scalar_lea.vmem %s1166_s3, %s747_s14 }
  0x1c   : > { %s1059_s28 = scalar_lea.vmem %s1163_s0, %s708_s17  ;;  %s1064_s23 = scalar_lea.vmem %s1167_s4, %s748_s16 }
  0x1d   : > { %289 = sbr.rel (%p711_p0) target bundleno = 36 (0x24), region = 44 }
  0x22   : > { %v939_v0 = vmov -inf  }
  0x23   : > { %290 = vst [vmem:[#allocation2] sm:$0x1] %v939_v0 }
  0x24 PF: > { %v298_v1 = vld [vmem:[%s1164_s1 + $0x10] sm:$0xff]  ;;  %v940_v2 = vmov 3   ;;  %v941_v3 = vmov 1   ;;  %v299_v4 = vld [vmem:[%s1164_s1 + $0x18] sm:$0xff]  ;;  %v942_v5 = vmov 2   ;;  %v297_v6 = vld [vmem:[%s1164_s1 + $0x8] sm:$0xff]  ;;  %v320_v26 = vlaneseq }
  0x25   : > { %833 = vset.pattern.permute.xlu0 %v940_v2  ;;  %829 = vset.pattern.permute.xlu1 %v941_v3  ;;  %v296_v7 = vld [vmem:[%s1164_s1] sm:$0xff]  ;;  %v943_v8 = vmov 0   ;;  %v293_v9 = vld [vmem:[%s1165_s2 + $0x10] sm:$0xff]  ;;  %v292_v10 = vld [vmem:[%s1165_s2 + $0x8] sm:$0xff]  ;;  %v944_v15 = vmov 0.0   ;;  %vm945_vm0 = vmmov 0  }
  0x26   : > { %393 = vperm.xlu0 %833, %v298_v1   ;;  %337 = vperm.xlu1 %829, %v298_v1   ;;  %v448_v11 = vld [vmem:[%s1064_s23 + $0x8] sm:$0xff]  ;;  %v450_v12 = vld [vmem:[%s1064_s23 + $0x18] sm:$0xff]  ;;  %v291_v14 = vld [vmem:[%s1165_s2] sm:$0xff]  ;;  %v321_v29 = vshrl.u32 %v320_v26, 7  ;;  %vm490_vm1 = vcmask 261120   ;;  %p718_p1 = scmp.ne.s32.totalorder %s921_s21, 1 }
  0x27   : > { %v294_v13 = vld [vmem:[%s1165_s2 + $0x18] sm:$0xff]  ;;  %727 = vmatprep.subr.bf16.mxu0 %v944_v15  ;;  %743 = vmatprep.subr.bf16.mxu1 %v944_v15  ;;  %v447_v16 = vld [vmem:[%s1064_s23] sm:$0xff]  ;;  %v449_v17 = vld [vmem:[%s1064_s23 + $0x10] sm:$0xff] }
  0x28   : > { %731 = vmatprep.mubr.msk.bf16.mxu0 %vm945_vm0, %v944_v15  ;;  %735 = vmatprep.mubr.msk.bf16.mxu1 %vm945_vm0, %v944_v15  ;;  %v451_v18 = vld [vmem:[%s1064_s23 + $0x20] sm:$0xff]  ;;  %v322_v31 = vsub.s32 0, %v321_v29  ;;  %v346_v32 = vsub.s32 1, %v321_v29  ;;  %v374_v37 = vsub.s32 2, %v321_v29  ;;  %v402_v39 = vsub.s32 3, %v321_v29  ;;  %v841_v26 = vld [vmem:[%s1054_s7 + $0x8] sm:$0xff]  }
  0x29   : > { %v295_v33 = vld [vmem:[%s1059_s28] sm:$0xf] }
  0x2a   : > { %834 = vset.pattern.permute.xlu0 %v942_v5  ;;  %341 = vperm.xlu1 %829, %v299_v4   ;;  %v323_v35 = vrot.slane %v295_v33, %v322_v31  ;;  %v347_v38 = vrot.slane %v295_v33, %v346_v32  ;;  %v375_v41 = vrot.slane %v295_v33, %v374_v37 }
  0x2b   : > { %365 = vperm.xlu0 %834, %v298_v1   ;;  %v403_v45 = vrot.slane %v295_v33, %v402_v39 }
  0x2e   : > { %830 = vset.pattern.permute.xlu1 %v942_v5 }
  0x2f   : > { %369 = vperm.xlu1 %830, %v299_v4   ;;  %361 = vperm.xlu0 %834, %v297_v6  }
  0x33   : > { %831 = vset.pattern.permute.xlu1 %v943_v8  ;;  %837 = vset.pattern.permute.xlu0 %v943_v8 }
  0x34   : > { %312 = vperm.xlu0 %837, %v298_v1   ;;  %302 = vperm.xlu1 %831, %v296_v7  }
  0x38   : > { %317 = vperm.xlu0 %837, %v299_v4   ;;  %832 = vset.pattern.permute.xlu1 %v941_v3 }
  0x39   : > { %329 = vperm.xlu1 %832, %v296_v7  }
  0x3c   : > { %307 = vperm.xlu0 %837, %v297_v6  }
  0x3d   : > { %333 = vperm.xlu1 %832, %v297_v6  }
  0x40   : > { %424 = vperm.xlu0 %837, %v293_v9  }
  0x41   : > { %835 = vset.pattern.permute.xlu1 %v940_v2 }
  0x42   : > { %397 = vperm.xlu1 %835, %v299_v4  }
  0x44   : > { %419 = vperm.xlu0 %837, %v292_v10  }
  0x46   : > { %836 = vset.pattern.permute.xlu1 %v942_v5 }
  0x47   : > { %357 = vperm.xlu1 %836, %v296_v7  }
  0x48   : > { %459 = vperm.xlu0 %837, %v448_v11  }
  0x4b   : > { %838 = vset.pattern.permute.xlu1 %v940_v2 }
  0x4c   : > { %385 = vperm.xlu1 %838, %v296_v7   ;;  %469 = vperm.xlu0 %837, %v450_v12  }
  0x50   : > { %389 = vperm.xlu1 %838, %v297_v6  }
  0x54   : > { %839 = vset.pattern.permute.xlu1 %v943_v8 }
  0x55   : > { %429 = vperm.xlu1 %839, %v294_v13  }
  0x59   : > { %414 = vperm.xlu1 %839, %v291_v14  }
  0x5d   : > { %454 = vperm.xlu1 %839, %v447_v16  }
  0x61   : > { %464 = vperm.xlu1 %839, %v449_v17  }
  0x65   : > { %474 = vperm.xlu1 %839, %v451_v18  }
  0xa1   : > { %v338_v19 = vpop.permute.xlu1 %337  ;;  %v394_v20 = vpop.permute.xlu0 %393 }
  0xa2   : > { %v350_v44 = vmul.f32 %v347_v38, %v338_v19  ;;  %v406_v53 = vmul.f32 %v403_v45, %v394_v20 }
  0xa5   : > { %v342_v21 = vpop.permute.xlu1 %341 }
  0xa6   : > { %v366_v22 = vpop.permute.xlu0 %365  ;;  %v351_v51 = vmul.f32 %v347_v38, %v342_v21 }
  0xa7   : > { %v378_v46 = vmul.f32 %v375_v41, %v366_v22 }
  0xaa   : > { %v370_v23 = vpop.permute.xlu1 %369  ;;  %v362_v25 = vpop.permute.xlu0 %361 }
  0xab   : > { %v377_v54 = vmul.f32 %v375_v41, %v362_v25  ;;  %v379_v59 = vmul.f32 %v375_v41, %v370_v23  ;;  %v840_v25 = vld [vmem:[%s1054_s7] sm:$0xff]  }
  0xaf   : > { %v303_v24 = vpop.permute.xlu1 %302  ;;  %v313_v28 = vpop.permute.xlu0 %312 }
  0xb0   : > { %v326_v40 = vmul.f32 %v323_v35, %v313_v28  ;;  %v324_v62 = vmul.f32 %v323_v35, %v303_v24 }
  0xb2   : > { %v354_v47 = vadd.f32 %v350_v44, %v326_v40 }
  0xb3   : > { %v318_v34 = vpop.permute.xlu0 %317 }
  0xb4   : > { %v330_v27 = vpop.permute.xlu1 %329  ;;  %v327_v48 = vmul.f32 %v323_v35, %v318_v34  ;;  %v382_v57 = vadd.f32 %v378_v46, %v354_v47 }
  0xb5   : > { %v348_v58 = vmul.f32 %v347_v38, %v330_v27  ;;  %v842_v27 = vld [vmem:[%s1054_s7 + $0x10] ss:$0 sps:$4 sm:$0xff]  }
  0xb6   : > { %v355_v55 = vadd.f32 %v351_v51, %v327_v48  ;;  %v410_v1 = vadd.f32 %v406_v53, %v382_v57 }
  0xb7   : > { %v308_v42 = vpop.permute.xlu0 %307  ;;  %v352_v5 = vadd.f32 %v348_v58, %v324_v62 }
  0xb8   : > { %v334_v30 = vpop.permute.xlu1 %333  ;;  %v325_v49 = vmul.f32 %v323_v35, %v308_v42  ;;  %v383_v4 = vadd.f32 %v379_v59, %v355_v55 }
  0xb9   : > { %v349_v50 = vmul.f32 %v347_v38, %v334_v30 }
  0xbb   : > { %v353_v56 = vadd.f32 %v349_v50, %v325_v49  ;;  %v425_v63 = vpop.permute.xlu0 %424 }
  0xbc   : > { %v434_v6 = vadd.f32 %v425_v63, %v410_v1 }
  0xbd   : > { %v398_v36 = vpop.permute.xlu1 %397  ;;  %v381_v3 = vadd.f32 %v377_v54, %v353_v56 }
  0xbe   : > { %v407_v60 = vmul.f32 %v403_v45, %v398_v36  ;;  %v438_v14 = vmax.f32 %v434_v6, 0.0 }
  0xbf   : > { %v420_v13 = vpop.permute.xlu0 %419 }
  0xc0   : > { %v411_v9 = vadd.f32 %v407_v60, %v383_v4 }
  0xc2   : > { %v358_v43 = vpop.permute.xlu1 %357 }
  0xc3   : > { %v376_v2 = vmul.f32 %v375_v41, %v358_v43  ;;  %v460_v29 = vpop.permute.xlu0 %459 }
  0xc5   : > { %v380_v11 = vadd.f32 %v376_v2, %v352_v5 }
  0xc7   : > { %v386_v52 = vpop.permute.xlu1 %385  ;;  %v470_v38 = vpop.permute.xlu0 %469 }
  0xc8   : > { %v404_v7 = vmul.f32 %v403_v45, %v386_v52 }
  0xca   : > { %v408_v18 = vadd.f32 %v404_v7, %v380_v11 }
  0xcb   : > { %v390_v61 = vpop.permute.xlu1 %389 }
  0xcc   : > { %v405_v0 = vmul.f32 %v403_v45, %v390_v61 }
  0xce   : > { %v409_v8 = vadd.f32 %v405_v0, %v381_v3  ;;  %v572_v0 = vld [vmem:[#allocation2] sm:$0x1] }
  0xd0   : > { %v430_v10 = vpop.permute.xlu1 %429  ;;  %v433_v16 = vadd.f32 %v420_v13, %v409_v8 }
  0xd1   : > { %v435_v12 = vadd.f32 %v430_v10, %v411_v9 }
  0xd2   : > { %v437_v22 = vmax.f32 %v433_v16, 0.0 }
  0xd3   : > { %v439_v17 = vmax.f32 %v435_v12, 0.0 }
  0xd4   : > { %v415_v19 = vpop.permute.xlu1 %414 }
  0xd5   : > { %v432_v20 = vadd.f32 %v415_v19, %v408_v18  ;;  %v441_v21 = vpack.c.bf16 %v439_v17, %v438_v14 }
  0xd7   : > { %v436_v23 = vmax.f32 %v432_v20, 0.0  ;;  %728 = vmatpush3.bf16.msra.mxu0 %v441_v21  ;;  %745 = vmatpush3.bf16.msra.mxu1 %v441_v21 }
  0xd8   : > { %729 = vmatprep.subr.bf16.mxu0 %v944_v15  ;;  %744 = vmatprep.subr.bf16.mxu1 %v944_v15  ;;  %v455_v28 = vpop.permute.xlu1 %454 }
  0xd9   : > { %v440_v24 = vpack.c.bf16 %v437_v22, %v436_v23 }
  0xdb   : > { %730 = vmatpush3.bf16.msra.mxu0 %v440_v24  ;;  %746 = vmatpush3.bf16.msra.mxu1 %v440_v24 }
  0xdc   : > { %v465_v34 = vpop.permute.xlu1 %464 }
  0xde   : > { %732 = vmatmul.mubr.msk.bf16.vlgmr.msra.gmra.mxu0 %vm490_vm1, %v840_v25  ;;  %736 = vmatmul.mubr.msk.bf16.vlgmr.msra.gmra.mxu1 %vm490_vm1, %v841_v26 }
  0xdf   : > { %739 = vmatprep.mubr.msk.bf16.mxu1 %vm945_vm0, %v944_v15 }
  0xe0   : > { %v475_v61 = vpop.permute.xlu1 %474 }
  0xe6   : > { %740 = vmatmul.mubr.msk.bf16.gmra.mxu1 %vm490_vm1, %v842_v27 }
 0x19e   : > { %v534_v30 = vpop.f32.mrf.mxu0  ;;  %v542_v31 = vpop.f32.mrf.mxu1 }
 0x19f   : > { %v535_v35 = vadd.f32 %v534_v30, %v455_v28  ;;  %v543_v39 = vadd.f32 %v542_v31, %v465_v34 }
 0x1a0   : > { %v733_v32 = vpop.f32.mrf.mxu0  ;;  %v737_v33 = vpop.f32.mrf.mxu1 }
 0x1a1   : > { %v556_v43 = vmul.f32 %v535_v35, %v535_v35  ;;  %v558_v46 = vmul.f32 %v543_v39, %v543_v39 }
 0x1a2   : > { %v537_v36 = vpop.f32.mrf.mxu0  ;;  %v545_v37 = vpop.f32.mrf.mxu1 }
 0x1a3   : > { %v538_v40 = vadd.f32 %v537_v36, %v460_v29  ;;  %v546_v15 = vadd.f32 %v545_v37, %v470_v38 }
 0x1a4   : > { %v734_v41 = vpop.f32.mrf.mxu0  ;;  %v738_v42 = vpop.f32.mrf.mxu1 }
 0x1a5   : > { %v557_v44 = vmul.f32 %v538_v40, %v538_v40  ;;  %v559_v49 = vmul.f32 %v546_v15, %v546_v15 }
 0x1a6   : > { %v550_v45 = vpop.f32.mrf.mxu1 }
 0x1a7   : > { %v560_v47 = vadd.f32 %v557_v44, %v556_v43  ;;  %v551_v62 = vadd.f32 %v550_v45, %v475_v61 }
 0x1a8   : > { %v741_v48 = vpop.f32.mrf.mxu1 }
 0x1a9   : > { %v561_v50 = vadd.f32 %v560_v47, %v558_v46 }
 0x1aa   : > { %v553_v51 = vpop.f32.mrf.mxu1 }
 0x1ab   : > { %v562_v52 = vadd.f32 %v561_v50, %v559_v49 }
 0x1ac   : > { %v742_v53 = vpop.f32.mrf.mxu1 }
 0x1ad   : > { %v563_v54 = vrot.slane %v562_v52, 4 }
 0x1af   : > { %v564_v55 = vadd.f32 %v563_v54, %v562_v52 }
 0x1b1   : > { %v565_v56 = vrot.slane %v564_v55, 2 }
 0x1b3   : > { %v566_v57 = vadd.f32 %v565_v56, %v564_v55 }
 0x1b5   : > { %v567_v58 = vrot.slane %v566_v57, 1 }
 0x1b7   : > { %v568_v59 = vadd.f32 %v567_v58, %v566_v57 }
 0x1b9   : > { %v569_v60 = vmax.f32 %v568_v59, 1e-16 }
 0x1bb   : > { %843 = vrsqrt.f32 %v569_v60 }
 0x1c8   : > { %v844_v63 = vpop.eup %843 }
 0x1c9   : > { %v571_v1 = vmul.f32 %v844_v63, %v551_v62  ;;  %578 = sbr.rel (%p718_p1) target bundleno = 672 (0x2a0), region = 48 }
 0x1cb   : > { %v573_v2 = vmax.f32 %v572_v0, %v571_v1 }
 0x1cd   : > { %574 = vst [vmem:[#allocation2] sm:$0x1] %v573_v2 }
 0x1ce   : > { %vm580_vm2 = vcmask 1040384  }
 0x1d4   : > { %v579_v3 = vld [vmem:[#allocation2] sm:$0x1] }
 0x1d5   : > { %v581_v4 = vsel %vm580_vm2, %v579_v3, -inf }
 0x1d6   : > { %582 = vmax.xlane.f32.xlu0 %v581_v4 }
 0x25f   : > { %v583_v5 = vpop.xlane.xlu0 %582 }
 0x260   : > { %v584_v6 = vrot.slane %v583_v5, 4 }
 0x262   : > { %v585_v7 = vmax.f32 %v583_v5, %v584_v6 }
 0x264   : > { %v586_v8 = vrot.slane %v585_v7, 2 }
 0x266   : > { %v587_v9 = vmax.f32 %v585_v7, %v586_v8 }
 0x268   : > { %v588_v10 = vrot.slane %v587_v9, 1 }
 0x26a   : > { %v589_v11 = vmax.f32 %v587_v9, %v588_v10 }
 0x26c   : > { %749 = vpush %v589_v11 }
 0x29d   : > { %s750_s23 = spop %749 }
 0x29e   : > { %v591_v12 = vstv %s750_s23 }
 0x29f   : > { %592 = vst [vmem:[%s1068_s20] sm:$0x1] %v591_v12 }
 0x2a0 PF: > { %s719_s21 = sshll.u32 %s925_s22, 4  ;;  %s606_s29 = sshll.u32 %s1068_s20, 4  ;;  %s607_s29 = int_to_ptr.vmem [resolvable:$true] %s606_s29 }
 0x2a1   : > { %s604_s24 = scalar_lea.hbm %s1168_s5, %s719_s21  ;;  %s1182_s9 = sand.u32 1, %s913_s19  }
 0x2a2   : > { %s594_s10 = scalar_lea.sflag [#allocation4], %s1182_s9  ;;  %s845_s13 = scalar_lea.vmem %s607_s29, 16 }
 0x2a3   : > { %p846_p2 = scmp.ne.s32.totalorder %s607_s29, %s845_s13  ;;  %s946_s14 = smov [#allocation3]  }
 0x2a4   : > { %s849_s15 = sshll.u32 %s946_s14, 4  ;;  %s850_s15 = int_to_ptr.vmem [resolvable:$false] %s849_s15 }
 0x2a5   : > { %p847_p4 = pnand %p846_p2, %p1026_p3  ;;  %s851_s16 = scalar_lea.vmem %s850_s15, 32 }
 0x2a6   : > { %p852_p6 = scmp.lt.s32.totalorder %s607_s29, %s850_s15  ;;  %p853_p7 = scmp.lt.s32.totalorder %s851_s16, %s845_s13 }
 0x2a7   : > { %p848_p5 = pneg %p847_p4 }
 0x2a8   : > { %p854_p8 = por %p853_p7, %p852_p6 }
 0x2aa   : > { %p855_p10 = pnand %p854_p8, %p848_p5 }
 0x2ac   : > { %858 = shalt.err (!%p855_p10)
}
 0x2ad   : > { %s859_s22 = scalar_lea.hbm %s604_s24, 16  ;;  %s863_s26 = scalar_lea.hbm %s1168_s5, 32 }
 0x2ae   : > { %p860_p11 = scmp.ne.s32.totalorder %s604_s24, %s859_s22  ;;  %p864_p0 = scmp.lt.s32.totalorder %s604_s24, %s1168_s5 }
 0x2af   : > { %p865_p1 = scmp.lt.s32.totalorder %s863_s26, %s859_s22 }
 0x2b0   : > { %p861_p12 = pnand %p860_p11, %p1026_p3 }
 0x2b1   : > { %p866_p2 = por %p865_p1, %p864_p0 }
 0x2b2   : > { %p862_p13 = pneg %p861_p12 }
 0x2b4   : > { %p867_p4 = pnand %p866_p2, %p862_p13 }
 0x2b6   : > { %870 = shalt.err (!%p867_p4)
}
 0x2b7   : > { %751 = dma.vmem_to_hbm [thread:$0]  (%p1026_p3), %s607_s29, 16, %s604_s24, %s594_s10  }
 0x2b8 PF: > { %p757_p5 = scmp.ge.s32.totalorder %s937_s25, 2  ;;  %s618_s11 = sand.u32 1, %s909_s18  }
 0x2b9   : > { %s619_s12 = scalar_lea.sflag [#allocation4], %s618_s11 }
 0x2ba   : > { %p754_p6 = pnand %p757_p5, %p1036_p9 }
 0x2bc   : > { %p755_p7 = pneg %p754_p6 }
 0x2be   : > { %904 = dma.done.wait (%p755_p7), %s619_s12, 16  }
 0x2bf   : > { %906 = vsyncadd (%p755_p7), %s619_s12, 4294967280  ;;  %s18_s25 = sadd.s32 1, %s937_s25   ;;  %s1183_s23 = sld [smem:[#allocation6_spill]] }
 0x2c0   : > { %p15_p8 = scmp.ge.s32.totalorder %s18_s25, 6   ;;  %s1184_s20 = sld [smem:[#allocation11_spill]] }
 0x2c1   : > { %s1185_s21 = sld [smem:[#allocation7_spill]]  ;;  %s1189_s18 = smov %s913_s19 }
 0x2c2   : > { %s1186_s22 = sld [smem:[#allocation8_spill]] }
 0x2c3   : > { %s1187_s30 = sld [smem:[#allocation9_spill]] }
 0x2c4   : > { %s1188_s24 = sld [smem:[#allocation10_spill]] }
 0x2c5   : > { %s1190_s19 = smov %s1183_s23  ;;  %17 = sbr.rel (!%p15_p8) target bundleno = 5 (0x5), region = 89 }
 0x2c9   : > { %s1191_s23 = smov %s1187_s30 }
 0x2ca   :  { %623 = vsyncpa [#allocation4], 1 }
 0x2cb   :  { %625 = vsyncpa [#allocation4 + $0x1], 1 }

</bundles_post_ra>
